<compile_context>
chip_gen: v7x
topology: tpu7x:2x2x1
jax: 0.10.0
libtpu: 0.0.40
codegen_flags: <defaults>
</compile_context>

<pallas_src>
import jax
import jax.numpy as jnp
from jax.experimental import pallas as pl
from jax.experimental.pallas import tpu as pltpu


def _gcn_kernel(idx_ref,            # SMEM (1,) int32   : target vertex index
                a_ref,              # VMEM [N, N]       : dense adjacency (dst x src)
                x_ref,              # VMEM [N, E]       : vertex embeddings
                w1_ref,             # VMEM [2E, H]      : l1.weight.T
                w2_ref, b2_ref,     # VMEM [2H, H], [1, H]
                w3_ref, b3_ref,     # VMEM [2H, H2], [1, H2]
                w4_ref,             # VMEM [H2, 2]      : l4.weight.T
                out_ref,            # VMEM [1, 2]
                x3_scratch):        # VMEM [N, H2]      scratch for target gather
    a = a_ref[...]
    x = x_ref[...]

    # --- layer 1: l1(cat([x, A@x])), bias=False  (single fused matmul) -----
    agg0 = jnp.dot(a, x, preferred_element_type=jnp.float32)
    x1 = jnp.dot(jnp.concatenate([x, agg0], axis=-1), w1_ref[...],
                 preferred_element_type=jnp.float32)
    identity = x1

    # --- layer 2: relu(l2(cat([x1, A@x1]))) -> L2 norm -> + identity -------
    agg1 = jnp.dot(a, x1, preferred_element_type=jnp.float32)
    x2 = jnp.dot(jnp.concatenate([x1, agg1], axis=-1), w2_ref[...],
                 preferred_element_type=jnp.float32) + b2_ref[...]
    x2 = jnp.maximum(x2, 0.0)
    nrm2 = jnp.sqrt(jnp.sum(x2 * x2, axis=1, keepdims=True))
    x2 = x2 * pl.reciprocal(nrm2 + 1e-6, approx=False)
    x2 = x2 + identity

    # --- layer 3: relu(l3(cat([x2, A@x2]))) -> dropout(eval)=id -> L2 norm -
    agg2 = jnp.dot(a, x2, preferred_element_type=jnp.float32)
    x3 = jnp.dot(jnp.concatenate([x2, agg2], axis=-1), w3_ref[...],
                 preferred_element_type=jnp.float32) + b3_ref[...]
    x3 = jnp.maximum(x3, 0.0)
    nrm3 = jnp.sqrt(jnp.sum(x3 * x3, axis=1, keepdims=True))
    x3 = x3 * pl.reciprocal(nrm3 + 1e-6, approx=False)

    # --- target gather (dynamic sublane slice, no one-hot matmul) + l4 -----
    x3_scratch[...] = x3
    xt = x3_scratch[pl.ds(idx_ref[0], 1), :]                       # [1, H2]
    out_ref[...] = jnp.dot(xt, w4_ref[...],
                           preferred_element_type=jnp.float32)     # [1, 2]


def prepare_params(params):
    """One-time weight preprocessing (hoisted out of the per-call path).

    torch Linear computes y = x @ W.T (+ b), and cat([x, agg]) @ W.T splits as
    x @ W[:, :K].T + agg @ W[:, K:].T — so a single transposed weight [2K, H]
    is exactly the fused-projection operand.
    """
    return {
        "w1t": jnp.asarray(params["w1"].T, jnp.float32),            # [2E, H]
        "w2t": jnp.asarray(params["w2"].T, jnp.float32),            # [2H, H]
        "b2": jnp.asarray(params["b2"], jnp.float32).reshape(1, -1),
        "w3t": jnp.asarray(params["w3"].T, jnp.float32),            # [2H, H2]
        "b3": jnp.asarray(params["b3"], jnp.float32).reshape(1, -1),
        "w4t": jnp.asarray(params["w4"].T, jnp.float32),            # [H2, 2]
    }


@jax.jit
def graph_conv_forward(edges, vertices, target_idx, prepped):
    """Pallas-backed forward of graph_conv (jitted end to end).

    edges:      [E, 2] int32, column 0 = destination, column 1 = source
    vertices:   [N, embedding_size] float32
    target_idx: int32 scalar (array) index of the target vertex
    prepped:    output of prepare_params()
    """
    n = vertices.shape[0]
    hid2 = prepped["w3t"].shape[1]

    # dense adjacency A[dst, src] += 1 per edge  (== torch_scatter.scatter_add)
    a = jnp.zeros((n, n), jnp.float32).at[edges[:, 0], edges[:, 1]].add(1.0)
    idx = jnp.asarray(target_idx, jnp.int32).reshape(1)

    smem = pl.BlockSpec(memory_space=pltpu.MemorySpace.SMEM)
    vmem = pl.BlockSpec(memory_space=pltpu.MemorySpace.VMEM)
    return pl.pallas_call(
        _gcn_kernel,
        out_shape=jax.ShapeDtypeStruct((1, 2), jnp.float32),
        in_specs=[smem] + [vmem] * 8,
        out_specs=vmem,
        scratch_shapes=[pltpu.VMEM((n, hid2), jnp.float32)],
    )(idx, a, vertices,
      prepped["w1t"], prepped["w2t"], prepped["b2"],
      prepped["w3t"], prepped["b3"], prepped["w4t"])


def _reference_forward(edges, vertices, target_idx, params):
    """Plain-JAX reference mirroring the torch code (for self-check)."""
    n = vertices.shape[0]
    a = jnp.zeros((n, n), jnp.float32).at[edges[:, 0], edges[:, 1]].add(1.0)

    def scatter(x):
        return a @ x

    x = vertices
    x = jnp.concatenate([x, scatter(x)], axis=1) @ params["w1"].T
    identity = x
    x = jax.nn.relu(jnp.concatenate([x, scatter(x)], axis=1) @ params["w2"].T + params["b2"])
    x = x / (jnp.linalg.norm(x, axis=1, keepdims=True) + 1e-6)
    x = x + identity
    x = jax.nn.relu(jnp.concatenate([x, scatter(x)], axis=1) @ params["w3"].T + params["b3"])
    x = x / (jnp.linalg.norm(x, axis=1, keepdims=True) + 1e-6)
    x_target = x[target_idx]
    return (x_target @ params["w4"].T)[None, :]


if __name__ == "__main__":
    # Small, deterministic synthetic problem.
    embedding_size, hidden_dim, hidden_dim2 = 32, 32, 16
    num_nodes, num_edges = 16, 40
    target_idx = 3

    key = jax.random.PRNGKey(0)
    k_v, k_e, k1, k2, kb2, k3, kb3, k4 = jax.random.split(key, 8)

    vertices = jax.random.normal(k_v, (num_nodes, embedding_size), jnp.float32)
    edges = jax.random.randint(k_e, (num_edges, 2), 0, num_nodes, jnp.int32)

    # Deterministic parameter init (matching the torch Linear shapes).
    def init(k, shape, fan_in):
        return (jax.random.normal(k, shape, jnp.float32) / jnp.sqrt(fan_in)).astype(jnp.float32)

    params = {
        "w1": init(k1, (hidden_dim, 2 * embedding_size), 2 * embedding_size),   # l1, no bias
        "w2": init(k2, (hidden_dim, 2 * hidden_dim), 2 * hidden_dim),            # l2
        "b2": init(kb2, (hidden_dim,), 2 * hidden_dim),
        "w3": init(k3, (hidden_dim2, 2 * hidden_dim), 2 * hidden_dim),           # l3
        "b3": init(kb3, (hidden_dim2,), 2 * hidden_dim),
        "w4": init(k4, (2, hidden_dim2), hidden_dim2),                           # l4, no bias
    }

    prepped = prepare_params(params)                # one-time weight prep
    target = jnp.array(target_idx, jnp.int32)       # traced scalar -> no recompiles per index

    out = graph_conv_forward(edges, vertices, target, prepped)
    out = jax.block_until_ready(out)

    ref = _reference_forward(edges, vertices, target_idx, params)
    assert out.shape == (1, 2)
    assert jnp.allclose(out, ref, atol=1e-4, rtol=1e-4)

    print("KERNEL_OK")
</pallas_src>

<mosaic_0001>
module attributes {stable_mosaic.version = 11 : i64} {
  func.func @_gcn_kernel(%arg0: memref<1xi32, #tpu.memory_space<smem>>, %arg1: memref<16x16xf32, #tpu.memory_space<vmem>>, %arg2: memref<16x32xf32, #tpu.memory_space<vmem>>, %arg3: memref<64x32xf32, #tpu.memory_space<vmem>>, %arg4: memref<64x32xf32, #tpu.memory_space<vmem>>, %arg5: memref<1x32xf32, #tpu.memory_space<vmem>>, %arg6: memref<64x16xf32, #tpu.memory_space<vmem>>, %arg7: memref<1x16xf32, #tpu.memory_space<vmem>>, %arg8: memref<16x2xf32, #tpu.memory_space<vmem>>, %arg9: memref<1x2xf32, #tpu.memory_space<vmem>>, %arg10: memref<16x16xf32, #tpu.memory_space<vmem>>) attributes {dimension_semantics = [], scalar_prefetch = 0 : i64, scratch_operands = 1 : i64, tpu.core_type = #tpu.core_type<tc>} {
    %c0 = arith.constant 0 : index
    %c0_0 = arith.constant 0 : index
    %0 = vector.load %arg1[%c0, %c0_0] : memref<16x16xf32, #tpu.memory_space<vmem>>, vector<16x16xf32>
    %c0_1 = arith.constant 0 : index
    %c0_2 = arith.constant 0 : index
    %1 = vector.load %arg2[%c0_1, %c0_2] : memref<16x32xf32, #tpu.memory_space<vmem>>, vector<16x32xf32>
    %cst = arith.constant dense<0.000000e+00> : vector<16x32xf32>
    %2 = tpu.matmul %0, %1, %cst {dimension_numbers = #tpu.dot_dimension_numbers<[1], [0], [0], [1], [0, 0, 1, 1], [], []>} : vector<16x16xf32>, vector<16x32xf32>, vector<16x32xf32> -> vector<16x32xf32>
    %3 = tpu.concatenate %1, %2 in 1 : vector<16x32xf32>, vector<16x32xf32> -> vector<16x64xf32>
    %c0_3 = arith.constant 0 : index
    %c0_4 = arith.constant 0 : index
    %4 = vector.load %arg3[%c0_3, %c0_4] : memref<64x32xf32, #tpu.memory_space<vmem>>, vector<64x32xf32>
    %cst_5 = arith.constant dense<0.000000e+00> : vector<16x32xf32>
    %5 = tpu.matmul %3, %4, %cst_5 {dimension_numbers = #tpu.dot_dimension_numbers<[1], [0], [0], [1], [0, 0, 1, 1], [], []>} : vector<16x64xf32>, vector<64x32xf32>, vector<16x32xf32> -> vector<16x32xf32>
    %cst_6 = arith.constant dense<0.000000e+00> : vector<16x32xf32>
    %6 = tpu.matmul %0, %5, %cst_6 {dimension_numbers = #tpu.dot_dimension_numbers<[1], [0], [0], [1], [0, 0, 1, 1], [], []>} : vector<16x16xf32>, vector<16x32xf32>, vector<16x32xf32> -> vector<16x32xf32>
    %7 = tpu.concatenate %5, %6 in 1 : vector<16x32xf32>, vector<16x32xf32> -> vector<16x64xf32>
    %c0_7 = arith.constant 0 : index
    %c0_8 = arith.constant 0 : index
    %8 = vector.load %arg4[%c0_7, %c0_8] : memref<64x32xf32, #tpu.memory_space<vmem>>, vector<64x32xf32>
    %cst_9 = arith.constant dense<0.000000e+00> : vector<16x32xf32>
    %9 = tpu.matmul %7, %8, %cst_9 {dimension_numbers = #tpu.dot_dimension_numbers<[1], [0], [0], [1], [0, 0, 1, 1], [], []>} : vector<16x64xf32>, vector<64x32xf32>, vector<16x32xf32> -> vector<16x32xf32>
    %c0_10 = arith.constant 0 : index
    %c0_11 = arith.constant 0 : index
    %10 = vector.load %arg5[%c0_10, %c0_11] : memref<1x32xf32, #tpu.memory_space<vmem>>, vector<1x32xf32>
    %11 = vector.broadcast %10 : vector<1x32xf32> to vector<16x32xf32>
    %12 = arith.addf %9, %11 : vector<16x32xf32>
    %cst_12 = arith.constant 0.000000e+00 : f32
    %13 = vector.broadcast %cst_12 : f32 to vector<16x32xf32>
    %14 = arith.maximumf %12, %13 : vector<16x32xf32>
    %15 = arith.mulf %14, %14 : vector<16x32xf32>
    %cst_13 = arith.constant dense<0.000000e+00> : vector<16xf32>
    %16 = vector.multi_reduction <add>, %15, %cst_13 [1] : vector<16x32xf32> to vector<16xf32>
    %17 = vector.shape_cast %16 : vector<16xf32> to vector<16x1xf32>
    %18 = math.sqrt %17 : vector<16x1xf32>
    %cst_14 = arith.constant 9.99999997E-7 : f32
    %19 = vector.broadcast %cst_14 : f32 to vector<16x1xf32>
    %20 = arith.addf %18, %19 : vector<16x1xf32>
    %21 = tpu.reciprocal %20 : vector<16x1xf32> -> vector<16x1xf32>
    %22 = vector.broadcast %21 : vector<16x1xf32> to vector<16x32xf32>
    %23 = arith.mulf %14, %22 : vector<16x32xf32>
    %24 = arith.addf %23, %5 : vector<16x32xf32>
    %cst_15 = arith.constant dense<0.000000e+00> : vector<16x32xf32>
    %25 = tpu.matmul %0, %24, %cst_15 {dimension_numbers = #tpu.dot_dimension_numbers<[1], [0], [0], [1], [0, 0, 1, 1], [], []>} : vector<16x16xf32>, vector<16x32xf32>, vector<16x32xf32> -> vector<16x32xf32>
    %26 = tpu.concatenate %24, %25 in 1 : vector<16x32xf32>, vector<16x32xf32> -> vector<16x64xf32>
    %c0_16 = arith.constant 0 : index
    %c0_17 = arith.constant 0 : index
    %27 = vector.load %arg6[%c0_16, %c0_17] : memref<64x16xf32, #tpu.memory_space<vmem>>, vector<64x16xf32>
    %cst_18 = arith.constant dense<0.000000e+00> : vector<16x16xf32>
    %28 = tpu.matmul %26, %27, %cst_18 {dimension_numbers = #tpu.dot_dimension_numbers<[1], [0], [0], [1], [0, 0, 1, 1], [], []>} : vector<16x64xf32>, vector<64x16xf32>, vector<16x16xf32> -> vector<16x16xf32>
    %c0_19 = arith.constant 0 : index
    %c0_20 = arith.constant 0 : index
    %29 = vector.load %arg7[%c0_19, %c0_20] : memref<1x16xf32, #tpu.memory_space<vmem>>, vector<1x16xf32>
    %30 = vector.broadcast %29 : vector<1x16xf32> to vector<16x16xf32>
    %31 = arith.addf %28, %30 : vector<16x16xf32>
    %cst_21 = arith.constant 0.000000e+00 : f32
    %32 = vector.broadcast %cst_21 : f32 to vector<16x16xf32>
    %33 = arith.maximumf %31, %32 : vector<16x16xf32>
    %34 = arith.mulf %33, %33 : vector<16x16xf32>
    %cst_22 = arith.constant dense<0.000000e+00> : vector<16xf32>
    %35 = vector.multi_reduction <add>, %34, %cst_22 [1] : vector<16x16xf32> to vector<16xf32>
    %36 = vector.shape_cast %35 : vector<16xf32> to vector<16x1xf32>
    %37 = math.sqrt %36 : vector<16x1xf32>
    %cst_23 = arith.constant 9.99999997E-7 : f32
    %38 = vector.broadcast %cst_23 : f32 to vector<16x1xf32>
    %39 = arith.addf %37, %38 : vector<16x1xf32>
    %40 = tpu.reciprocal %39 : vector<16x1xf32> -> vector<16x1xf32>
    %41 = vector.broadcast %40 : vector<16x1xf32> to vector<16x16xf32>
    %42 = arith.mulf %33, %41 : vector<16x16xf32>
    %c0_24 = arith.constant 0 : index
    %c0_25 = arith.constant 0 : index
    %43 = vector.load %arg10[%c0_24, %c0_25] : memref<16x16xf32, #tpu.memory_space<vmem>>, vector<16x16xf32>
    tpu.vector_store %arg10[%c0_24, %c0_25], %42 {strides = array<i32>} : memref<16x16xf32, #tpu.memory_space<vmem>>, vector<16x16xf32>,
    %c0_26 = arith.constant 0 : index
    %44 = memref.load %arg0[%c0_26] : memref<1xi32, #tpu.memory_space<smem>>
    %45 = arith.index_cast %44 : i32 to index
    %c0_27 = arith.constant 0 : index
    %46 = vector.load %arg10[%45, %c0_27] : memref<16x16xf32, #tpu.memory_space<vmem>>, vector<1x16xf32>
    %c0_28 = arith.constant 0 : index
    %c0_29 = arith.constant 0 : index
    %47 = vector.load %arg8[%c0_28, %c0_29] : memref<16x2xf32, #tpu.memory_space<vmem>>, vector<16x2xf32>
    %cst_30 = arith.constant dense<0.000000e+00> : vector<1x2xf32>
    %48 = tpu.matmul %46, %47, %cst_30 {dimension_numbers = #tpu.dot_dimension_numbers<[1], [0], [0], [1], [0, 0, 1, 1], [], []>} : vector<1x16xf32>, vector<16x2xf32>, vector<1x2xf32> -> vector<1x2xf32>
    %c0_31 = arith.constant 0 : index
    %c0_32 = arith.constant 0 : index
    %49 = vector.load %arg9[%c0_31, %c0_32] : memref<1x2xf32, #tpu.memory_space<vmem>>, vector<1x2xf32>
    tpu.vector_store %arg9[%c0_31, %c0_32], %48 {strides = array<i32>} : memref<1x2xf32, #tpu.memory_space<vmem>>, vector<1x2xf32>,
    return
  }
}

</mosaic_0001>

<bundles_post_ra>
// kernel: graph_conv_forward.1
= control target key start
LH: loop header
LB: loop body
LE: loop exit
PB: predicated region body
PF: predicated region fallthrough
CT: control target
= control target key end

     0   :  { %vm38_vm0 = vcmask 130048   ;;  %s1212_s0 = inlined_call_operand.<no memory space> [shape: s32[1], index: 0, kind: input, shape index: {}]   ;;  %s1213_s1 = inlined_call_operand.vmem [shape: f32[16,16], index: 1, kind: input, shape index: {}]   ;;  %s1214_s2 = inlined_call_operand.vmem [shape: f32[16,32], index: 2, kind: input, shape index: {}]   ;;  %s1215_s3 = inlined_call_operand.vmem [shape: f32[64,32], index: 3, kind: input, shape index: {}]   ;;  %s1216_s4 = inlined_call_operand.vmem [shape: f32[64,32], index: 4, kind: input, shape index: {}]   ;;  %s1217_s5 = inlined_call_operand.vmem [shape: f32[1,32], index: 5, kind: input, shape index: {}]   ;;  %s1218_s6 = inlined_call_operand.vmem [shape: f32[64,16], index: 6, kind: input, shape index: {}]   ;;  %s1219_s7 = inlined_call_operand.vmem [shape: f32[1,16], index: 7, kind: input, shape index: {}]   ;;  %s1220_s8 = inlined_call_operand.vmem [shape: f32[16,2], index: 8, kind: input, shape index: {}]   ;;  %s1221_s9 = inlined_call_operand.hbm [shape: f32[1,2], index: 9, kind: output, shape index: {}]  }
   0x1   :  { %v36_v0 = vld [vmem:[%s1214_s2] sm:$0xff]  ;;  %v37_v1 = vld [vmem:[%s1214_s2 + $0x8] sm:$0xff] }
   0x2   :  { %v1059_v2 = vld [vmem:[%s1213_s1] sm:$0xff]  ;;  %v887_v3 = vpack.c.bf16 %v37_v1, %v36_v0 }
   0x3   :  { %806 = vmatprep.mubr.msk.f32.mxu0 %vm38_vm0, %v1059_v2 }
   0x4   :  { %15 = vsyncpa [#allocation5], 0  ;;  %888 = vmatprep.subr.bf16.mxu0 %v887_v3  ;;  %v1066_v4 = vld [vmem:[%s1213_s1 + $0x8] sm:$0xff]  ;;  %v131_v5 = vld [vmem:[%s1215_s3] sm:$0xff]  ;;  %s995_s10 = smov 32   ;;  %vm128_vm1 = vcmask 261120  }
   0x5   :  { %890 = vmatpush3.bf16.msra.mxu0 %v887_v3  ;;  %v132_v6 = vld [vmem:[%s1215_s3 + $0x8] sm:$0xff]  ;;  %v133_v7 = vld [vmem:[%s1215_s3 + $0x10] sm:$0xff]  ;;  %v134_v9 = vld [vmem:[%s1215_s3 + $0x18] sm:$0xff]  ;;  %vm139_vm2 = vcmask 523264   ;;  %vm997_vm7 = vmmov 0   ;;  %s648_s1 = scalar_lea.vmem [#allocation2], %s1212_s0 }
   0x6   :  { %v891_v8 = vpack.c.bf16 %v132_v6, %v131_v5  ;;  %v895_v10 = vpack.c.bf16 %v134_v9, %v133_v7  ;;  %v135_v11 = vld [vmem:[%s1215_s3 + $0x20] sm:$0xff]  ;;  %v136_v12 = vld [vmem:[%s1215_s3 + $0x28] sm:$0xff]  ;;  %v137_v14 = vld [vmem:[%s1215_s3 + $0x30] sm:$0xff]  ;;  %s999_s22 = smov [#allocation4]   ;;  %vm725_vm12 = vcmask 8192  }
   0x7   :  { %v899_v13 = vpack.c.bf16 %v136_v12, %v135_v11  ;;  %v138_v15 = vld [vmem:[%s1215_s3 + $0x38] sm:$0xff]  ;;  %v306_v26 = vld [vmem:[%s1216_s4] sm:$0xff]  ;;  %v307_v27 = vld [vmem:[%s1216_s4 + $0x8] sm:$0xff]  ;;  %s733_s23 = sshll.u32 %s999_s22, 4  ;;  %s734_s23 = int_to_ptr.vmem [resolvable:$true] %s733_s23 }
   0x8   :  { %807 = vmatmul.mubr.msk.f32.vlgmr.msra.gmra.mrb[0].mxu0 %vm38_vm0, %v1066_v4  ;;  %892 = vmatprep.subr.bf16.mxu1 %v891_v8  ;;  %v903_v16 = vpack.c.bf16 %v138_v15, %v137_v14  ;;  %v308_v28 = vld [vmem:[%s1216_s4 + $0x10] sm:$0xff]  ;;  %v911_v29 = vpack.c.bf16 %v307_v27, %v306_v26  ;;  %v309_v30 = vld [vmem:[%s1216_s4 + $0x18] sm:$0xff]  ;;  %v310_v32 = vld [vmem:[%s1216_s4 + $0x20] sm:$0xff]  ;;  %s975_s24 = scalar_lea.vmem %s734_s23, 32  ;;  %p976_p1 = scmp.lt.s32.totalorder %s734_s23, %s734_s23 }
   0x9   :  { %832 = vmatprep.mubr.msk.f32.mxu0 %vm38_vm0, %v1059_v2  ;;  %894 = vmatpush3.bf16.msra.mxu1 %v891_v8  ;;  %v915_v31 = vpack.c.bf16 %v309_v30, %v308_v28  ;;  %v311_v33 = vld [vmem:[%s1216_s4 + $0x28] sm:$0xff]  ;;  %v312_v35 = vld [vmem:[%s1216_s4 + $0x30] sm:$0xff]  ;;  %v313_v36 = vld [vmem:[%s1216_s4 + $0x38] sm:$0xff]  ;;  %s971_s4 = scalar_lea.vmem %s734_s23, 16 }
   0xa   :  { %896 = vmatprep.subr.bf16.mxu1 %v895_v10  ;;  %v919_v34 = vpack.c.bf16 %v311_v33, %v310_v32  ;;  %v923_v37 = vpack.c.bf16 %v313_v36, %v312_v35  ;;  %v748_v44 = vld [vmem:[%s1217_s5] ss:$0 sm:$0xff]  ;;  %v520_v14 = vld [vmem:[%s1218_s6 + $0x8] sm:$0xff]  ;;  %v521_v15 = vld [vmem:[%s1218_s6 + $0x10] sm:$0xff]  ;;  %p972_p0 = scmp.ne.s32.totalorder %s734_s23, %s971_s4  ;;  %p977_p2 = scmp.lt.s32.totalorder %s975_s24, %s971_s4 }
   0xb   :  { %v753_v30 = vld [vmem:[%s1219_s7] ss:$0 sm:$0xff] }
   0xc   :  { %p978_p3 = por %p977_p2, %p976_p1 }
   0xd   :  { %898 = vmatpush3.bf16.msra.mxu1 %v895_v10 }
   0xe   :  { %900 = vmatprep.subr.bf16.mxu1 %v899_v13  ;;  %p979_p4 = pnand %p978_p3, %p972_p0 }
  0x11   :  { %902 = vmatpush3.bf16.msra.mxu1 %v899_v13  ;;  %v519_v13 = vld [vmem:[%s1218_s6] sm:$0xff] }
  0x12   :  { %904 = vmatprep.subr.bf16.mxu1 %v903_v16 }
  0x15   :  { %906 = vmatpush3.bf16.msra.mxu1 %v903_v16  ;;  %v931_v16 = vpack.c.bf16 %v520_v14, %v519_v13 }
  0x17   :  { %932 = vmatprep.subr.bf16.mxu1 %v931_v16 }
  0xdb   :  { %v808_v17 = vpop.f32.mrb[0].mxu0 }
  0xdc   :  { %v111_v18 = vpop.f32.mrb[1].mxu0 }
  0xdd   :  { %122 = vrot.lane.b32.xlu0 %v111_v18, %s995_s10 }
  0xe1   :  { %124 = vrot.lane.b32.xlu0 %v808_v17, %s995_s10  ;;  %v522_v17 = vld [vmem:[%s1218_s6 + $0x18] sm:$0xff] }
  0xe2   :  { %v935_v18 = vpack.c.bf16 %v522_v17, %v521_v15 }
 0x14f   :  { %v123_v19 = vpop.permute.xlu0 %122 }
 0x150   :  { %v129_v20 = vsel %vm128_vm1, %v36_v0, %v123_v19  ;;  %v524_v19 = vld [vmem:[%s1218_s6 + $0x28] sm:$0xff] }
 0x151   :  { %825 = vmatprep.mubr.msk.f32.mxu1 %vm139_vm2, %v129_v20 }
 0x153   :  { %v125_v21 = vpop.permute.xlu0 %124 }
 0x154   :  { %v130_v22 = vsel %vm128_vm1, %v37_v1, %v125_v21  ;;  %v525_v21 = vld [vmem:[%s1218_s6 + $0x30] sm:$0xff] }
 0x155   :  { %826 = vmatmul.mubr.msk.f32.vlgmr.msra.gmra.mrb[0].mxu1 %vm139_vm2, %v130_v22  ;;  %v526_v22 = vld [vmem:[%s1218_s6 + $0x38] sm:$0xff] }
 0x156   :  { %934 = vmatpush3.bf16.msra.mxu1 %v931_v16 }
 0x157   :  { %936 = vmatprep.subr.bf16.mxu1 %v935_v18 }
 0x15a   :  { %938 = vmatpush3.bf16.msra.mxu1 %v935_v18 }
 0x228   :  { %v1102_v23 = vpop.f32.mrb[0].mxu1 }
 0x229   :  { %v1104_v24 = vpop.f32.mrb[1].mxu1 }
 0x22a   :  { %v907_v25 = vpack.c.bf16 %v1102_v23, %v1104_v24 }
 0x22c   :  { %908 = vmatprep.subr.bf16.mxu0 %v907_v25 }
 0x22d   :  { %910 = vmatpush3.bf16.msra.mxu0 %v907_v25 }
 0x22e   :  { %912 = vmatprep.subr.bf16.mxu0 %v911_v29 }
 0x230   :  { %833 = vmatmul.mubr.msk.f32.vlgmr.msra.gmra.mrb[2].mxu0 %vm38_vm0, %v1066_v4 }
 0x231   :  { %914 = vmatpush3.bf16.msra.mxu0 %v911_v29 }
 0x232   :  { %916 = vmatprep.subr.bf16.mxu0 %v915_v31 }
 0x235   :  { %918 = vmatpush3.bf16.msra.mxu0 %v915_v31 }
 0x236   :  { %920 = vmatprep.subr.bf16.mxu0 %v919_v34 }
 0x239   :  { %922 = vmatpush3.bf16.msra.mxu0 %v919_v34 }
 0x23a   :  { %924 = vmatprep.subr.bf16.mxu0 %v923_v37 }
 0x23d   :  { %926 = vmatpush3.bf16.msra.mxu0 %v923_v37 }
 0x303   :  { %v834_v38 = vpop.f32.mrb[2].mxu0 }
 0x304   :  { %v287_v39 = vpop.f32.mrb[3].mxu0 }
 0x305   :  { %298 = vrot.lane.b32.xlu1 %v287_v39, %s995_s10 }
 0x309   :  { %300 = vrot.lane.b32.xlu1 %v834_v38, %s995_s10 }
 0x377   :  { %v299_v40 = vpop.permute.xlu1 %298 }
 0x378   :  { %v304_v41 = vsel %vm128_vm1, %v1104_v24, %v299_v40 }
 0x379   :  { %851 = vmatprep.mubr.msk.f32.mxu0 %vm139_vm2, %v304_v41  ;;  %v650_v41 = vld [vmem:[%s1220_s8] sm:$0xff] }
 0x37b   :  { %v301_v42 = vpop.permute.xlu1 %300 }
 0x37c   :  { %v305_v43 = vsel %vm128_vm1, %v1102_v23, %v301_v42  ;;  %v651_v42 = vld [vmem:[%s1220_s8 + $0x8] sm:$0xff] }
 0x37d   :  { %852 = vmatmul.mubr.msk.f32.vlgmr.msra.gmra.mrb[4].mxu0 %vm139_vm2, %v305_v43  ;;  %v996_v43 = vmov 0.0|0.0  }
 0x37e   :  { %858 = vmatprep.mubr.msk.f32.mxu0 %vm38_vm0, %v1059_v2 }
 0x450   :  { %v853_v45 = vpop.f32.mrb[4].mxu0 }
 0x451   :  { %v399_v46 = vadd.f32 %v853_v45, %v748_v44  ;;  %v393_v47 = vpop.f32.mrb[5].mxu0  ;;  %v998_v45 = vmov 0.0  }
 0x452   :  { %v394_v48 = vadd.f32 %v748_v44, %v393_v47  ;;  %v948_v44 = vpack.c.bf16 %v651_v42, %v650_v41 }
 0x453   :  { %v403_v49 = vmax.f32 %v399_v46, 0.0 }
 0x454   :  { %v402_v50 = vmax.f32 %v394_v48, 0.0 }
 0x455   :  { %v405_v51 = vmul.f32 %v403_v49, %v403_v49 }
 0x456   :  { %v404_v52 = vmul.f32 %v402_v50, %v402_v50 }
 0x457   :  { %v409_v53 = vsel %vm128_vm1, %v405_v51, 0.0 }
 0x458   :  { %410 = vadd.xlane.f32.xlu1 %v409_v53  ;;  %v406_v54 = vsel %vm128_vm1, %v404_v52, 0.0 }
 0x459   :  { %407 = vadd.xlane.f32.xlu0 %v406_v54 }
 0x4e5   :  { %v411_v55 = vpop.xlane.xlu1 %410 }
 0x4e6   :  { %955 = vrsqrt.f32 %v411_v55  ;;  %v408_v56 = vpop.xlane.xlu0 %407  ;;  %vm421_vm3 = vcmp.eq.f32.partialorder %v411_v55, inf  ;;  %v424_v60 = vand.u32 2147483648, %v411_v55  ;;  %vm423_vm4 = vcmp.eq.f32.partialorder %v411_v55, 0.0 }
 0x4e7   :  { %957 = vrsqrt.f32 %v408_v56  ;;  %vm414_vm5 = vcmp.eq.f32.partialorder %v408_v56, inf  ;;  %v417_v63 = vand.u32 2147483648, %v408_v56  ;;  %vm416_vm6 = vcmp.eq.f32.partialorder %v408_v56, 0.0 }
 0x4f0   :  { %v956_v57 = vpop.eup %955 }
 0x4f1   :  { %v958_v58 = vpop.eup %957  ;;  %v420_v59 = vmul.f32 %v956_v57, %v411_v55 }
 0x4f2   :  { %v413_v61 = vmul.f32 %v958_v58, %v408_v56 }
 0x4f3   :  { %v422_v62 = vsel %vm421_vm3, %v411_v55, %v420_v59 }
 0x4f4   :  { %v425_v0 = vsel %vm423_vm4, %v424_v60, %v422_v62  ;;  %v415_v1 = vsel %vm414_vm5, %v408_v56, %v413_v61 }
 0x4f5   :  { %v427_v2 = vadd.f32 1e-06, %v425_v0  ;;  %v418_v3 = vsel %vm416_vm6, %v417_v63, %v415_v1 }
 0x4f6   :  { %v426_v5 = vadd.f32 1e-06, %v418_v3 }
 0x4f7   :  { %959 = vrcp.f32 %v427_v2 }
 0x4f8   :  { %961 = vrcp.f32 %v426_v5 }
 0x501   :  { %v960_v6 = vpop.eup %959 }
 0x502   :  { %v962_v7 = vpop.eup %961  ;;  %v431_v8 = vmul.f32 %v960_v6, %v403_v49 }
 0x503   :  { %v430_v9 = vmul.f32 %v962_v7, %v402_v50 }
 0x504   :  { %v433_v10 = vadd.f32 %v1102_v23, %v431_v8  ;;  %v943_v23 = vpack.c.bf16 %v526_v22, %v525_v21 }
 0x505   :  { %v432_v11 = vadd.f32 %v430_v9, %v1104_v24 }
 0x507   :  { %v927_v12 = vpack.c.bf16 %v433_v10, %v432_v11 }
 0x509   :  { %928 = vmatprep.subr.bf16.mxu0 %v927_v12 }
 0x50a   :  { %930 = vmatpush3.bf16.msra.mxu0 %v927_v12 }
 0x50b   :  { %947 = vmatprep.subr.bf16.mxu0 %v996_v43 }
 0x50d   :  { %859 = vmatmul.mubr.msk.f32.vlgmr.msra.gmra.mrb[6].mxu0 %vm38_vm0, %v1066_v4  ;;  %v523_v4 = vld [vmem:[%s1218_s6 + $0x20] sm:$0xff] }
 0x50e   :  { %v939_v20 = vpack.c.bf16 %v524_v19, %v523_v4  ;;  %884 = vmatprep.mubr.msk.f32.mxu0 %vm997_vm7, %v998_v45  ;;  %949 = vmatpush3.bf16.msra.mxu0 %v948_v44 }
 0x510   :  { %940 = vmatprep.subr.bf16.mxu1 %v939_v20 }
 0x511   :  { %942 = vmatpush3.bf16.msra.mxu1 %v939_v20 }
 0x512   :  { %944 = vmatprep.subr.bf16.mxu1 %v943_v23 }
 0x515   :  { %946 = vmatpush3.bf16.msra.mxu1 %v943_v23 }
 0x5e0   :  { %v860_v24 = vpop.f32.mrb[6].mxu0 }
 0x5e1   :  { %513 = vrot.lane.b32.xlu1 %v860_v24, %s995_s10  ;;  %v500_v25 = vpop.f32.mrb[7].mxu0 }
 0x5e2   :  { %511 = vrot.lane.b32.xlu0 %v500_v25, %s995_s10 }
 0x653   :  { %v514_v26 = vpop.permute.xlu1 %513 }
 0x654   :  { %v512_v27 = vpop.permute.xlu0 %511  ;;  %v518_v29 = vsel %vm128_vm1, %v433_v10, %v514_v26 }
 0x655   :  { %v517_v28 = vsel %vm128_vm1, %v432_v11, %v512_v27 }
 0x656   :  { %877 = vmatprep.mubr.msk.f32.mxu1 %vm139_vm2, %v517_v28 }
 0x657   :  { %878 = vmatmul.mubr.msk.f32.vlgmr.msra.gmra.mrb[2].mxu1 %vm139_vm2, %v518_v29 }
 0x72a   :  { %v879_v31 = vpop.f32.mrb[2].mxu1 }
 0x72b   :  { %v612_v32 = vadd.f32 %v879_v31, %v753_v30  ;;  %v606_v33 = vpop.f32.mrb[3].mxu1 }
 0x72c   :  { %v607_v34 = vadd.f32 %v753_v30, %v606_v33 }
 0x72d   :  { %v616_v35 = vmax.f32 %v612_v32, 0.0 }
 0x72e   :  { %v615_v36 = vmax.f32 %v607_v34, 0.0 }
 0x72f   :  { %v618_v37 = vmul.f32 %v616_v35, %v616_v35 }
 0x730   :  { %v617_v38 = vmul.f32 %v615_v36, %v615_v36 }
 0x731   :  { %v622_v39 = vsel %vm38_vm0, %v618_v37, 0.0 }
 0x732   :  { %623 = vadd.xlane.f32.xlu1 %v622_v39  ;;  %v619_v40 = vsel %vm38_vm0, %v617_v38, 0.0 }
 0x733   :  { %620 = vadd.xlane.f32.xlu0 %v619_v40 }
 0x7bf   :  { %v624_v46 = vpop.xlane.xlu1 %623 }
 0x7c0   :  { %963 = vrsqrt.f32 %v624_v46  ;;  %v621_v47 = vpop.xlane.xlu0 %620  ;;  %vm634_vm8 = vcmp.eq.f32.partialorder %v624_v46, inf  ;;  %v637_v51 = vand.u32 2147483648, %v624_v46  ;;  %vm636_vm9 = vcmp.eq.f32.partialorder %v624_v46, 0.0 }
 0x7c1   :  { %965 = vrsqrt.f32 %v621_v47  ;;  %vm627_vm10 = vcmp.eq.f32.partialorder %v621_v47, inf  ;;  %v630_v54 = vand.u32 2147483648, %v621_v47  ;;  %vm629_vm11 = vcmp.eq.f32.partialorder %v621_v47, 0.0 }
 0x7ca   :  { %v964_v48 = vpop.eup %963 }
 0x7cb   :  { %v966_v49 = vpop.eup %965  ;;  %v633_v50 = vmul.f32 %v964_v48, %v624_v46 }
 0x7cc   :  { %v626_v52 = vmul.f32 %v966_v49, %v621_v47 }
 0x7cd   :  { %v635_v53 = vsel %vm634_vm8, %v624_v46, %v633_v50 }
 0x7ce   :  { %v638_v55 = vsel %vm636_vm9, %v637_v51, %v635_v53  ;;  %v628_v56 = vsel %vm627_vm10, %v621_v47, %v626_v52 }
 0x7cf   :  { %v640_v57 = vadd.f32 1e-06, %v638_v55  ;;  %v631_v58 = vsel %vm629_vm11, %v630_v54, %v628_v56 }
 0x7d0   :  { %v639_v59 = vadd.f32 1e-06, %v631_v58 }
 0x7d1   :  { %967 = vrcp.f32 %v640_v57 }
 0x7d2   :  { %969 = vrcp.f32 %v639_v59 }
 0x7db   :  { %v968_v60 = vpop.eup %967 }
 0x7dc   :  { %v970_v61 = vpop.eup %969  ;;  %v644_v62 = vmul.f32 %v968_v60, %v616_v35 }
 0x7dd   :  { %v643_v63 = vmul.f32 %v970_v61, %v615_v36 }
 0x7de   :  { %646 = vst.msk [vmem:[#allocation2 + $0x8] sm:$0xff] %vm38_vm0, %v644_v62 }
 0x7df   :  { %645 = vst.msk [vmem:[#allocation2] sm:$0xff] %vm38_vm0, %v643_v63 }
 0x7e6   :  { %v649_v0 = vld [vmem:[%s648_s1] sm:$0x1] }
 0x7e7   :  { %885 = vmatmul.mubr.msk.f32.vlgmr.msra.gmra.mrb[8].mxu0 %vm38_vm0, %v649_v0 }
 0x8ba   :  { %v721_v1 = vpop.f32.mrb[8].mxu0 }
 0x8bb   :  { %726 = vst.msk [vmem:[#allocation4] sm:$0x1] %vm725_vm12, %v721_v1  ;;  %v886_v2 = vpop.f32.mrb[9].mxu0 }
 0x8bc   :  { %982 = shalt.err (!%p979_p4)
}
 0x8bd   :  { %s983_s25 = scalar_lea.hbm %s1221_s9, 16 }
 0x8be   :  { %p984_p5 = scmp.ne.s32.totalorder %s1221_s9, %s983_s25  ;;  %p987_p6 = scmp.lt.u32.totalorder %s983_s25, %s1221_s9 }
 0x8c0   :  { %p989_p7 = pnand %p987_p6, %p984_p5 }
 0x8c2   :  { %992 = shalt.err (!%p989_p7)
}
 0x8c3   :  { %736 = dma.vmem_to_hbm [thread:$0]  %s734_s23, 16, %s1221_s9, [#allocation5]  }
 0x8c4   :  { %993 = dma.done.wait [#allocation5], 16  }
 0x8c5   :  { %994 = vsyncadd [#allocation5], 4294967280 }
 0x8c6   :  { %740 = vsyncpa [#allocation5], 1 }

</bundles_post_ra>
